<compile_context>
chip_gen: v6e
topology: v6e:2x2x1
jax: 0.10.0
libtpu: 0.0.40
codegen_flags: <defaults>
</compile_context>

<pallas_src>
import jax
import jax.numpy as jnp
from jax.experimental import pallas as pl
from jax.experimental.pallas import tpu as pltpu


def gmf_kernel(u_ref, i_ref, w_ref, b_ref, out_ref):
    """One grid step processes one batch tile.

    u_ref, i_ref : (TB, D)  gathered user/item embedding tiles (row-major)
    w_ref        : (1, D)   affine_output weight row (VMEM, constant block)
    b_ref        : (1, 1)   affine_output bias (SMEM scalar)
    out_ref      : (TB, 1)  predicted-rating tile
    """
    prod = u_ref[...] * i_ref[...]                       # VPU elementwise, (TB, D)
    weighted = prod * w_ref[...]                         # broadcast (1, D) over rows
    logit = jnp.sum(weighted, axis=1, keepdims=True)     # lane reduce -> (TB, 1)
    logit = logit + b_ref[0, 0]                          # scalar bias from SMEM
    out_ref[...] = jax.nn.sigmoid(logit).astype(out_ref.dtype)


def _choose_tile(batch, latent_dim):
    """Pick a batch-tile size (multiple of 128)."""
    b128 = pl.cdiv(batch, 128) * 128
    if b128 <= 256:
        tb = b128                       # small batch: one tile, minimal padding
    else:
        # >= 2 tiles (keeps v7x's dual TensorCores busy), cap at 2048 for
        # near-roofline DMAs without over-inflating padding.
        half = pl.cdiv(pl.cdiv(b128, 2), 128) * 128
        tb = min(2048, half)
    # Keep 2 inputs * 2 pipeline buffers * D * tb * 4 B under ~24 MiB.
    vmem_cap = max(128, ((24 * 1024 * 1024) // (16 * latent_dim)) // 128 * 128)
    return max(128, min(tb, vmem_cap))


def gmf_forward(user_indices, item_indices, user_emb, item_emb, w, b, *, tb=None):
    """Pallas GMF forward.

    user_indices / item_indices : (B,) int32
    user_emb : (num_users, D) f32     item_emb : (num_items, D) f32
    w        : (D, 1) f32             b        : (1,) or (1, 1) f32
    returns  : (B, 1) f32 predicted ratings
    """
    B = user_indices.shape[0]
    D = user_emb.shape[1]

    if tb is None:
        tb = _choose_tile(B, D)
    num_tiles = pl.cdiv(B, tb)
    b_pad = num_tiles * tb
    pad = b_pad - B

    # Pad the cheap index vectors (not the gathered f32 data), then gather once
    # directly at the padded size: no extra full-HBM pad/transpose passes.
    ui = user_indices.astype(jnp.int32)
    ii = item_indices.astype(jnp.int32)
    if pad:
        ui = jnp.pad(ui, (0, pad))
        ii = jnp.pad(ii, (0, pad))
    u_g = jnp.take(user_emb, ui, axis=0)                 # (b_pad, D)
    i_g = jnp.take(item_emb, ii, axis=0)                 # (b_pad, D)

    w_row = w.reshape(1, D).astype(jnp.float32)          # (1, D)
    b_smem = jnp.asarray(b, jnp.float32).reshape(1, 1)   # (1, 1) scalar

    cost = pl.CostEstimate(
        flops=3 * b_pad * D,                             # mul, mul-by-w, add-reduce
        transcendentals=b_pad,                           # sigmoid
        bytes_accessed=2 * b_pad * D * 4 + b_pad * 4 + D * 4 + 4,
    )

    grid_spec = pltpu.PrefetchScalarGridSpec(
        num_scalar_prefetch=0,
        grid=(num_tiles,),
        in_specs=[
            # user / item embedding tiles: batch tiled, latent dim full
            pl.BlockSpec((tb, D), lambda t: (t, 0)),
            pl.BlockSpec((tb, D), lambda t: (t, 0)),
            # affine weight row, same block every step (fetched once)
            pl.BlockSpec((1, D), lambda t: (0, 0)),
            # affine bias: single scalar, keep it in SMEM
            pl.BlockSpec(memory_space=pltpu.MemorySpace.SMEM),
        ],
        out_specs=pl.BlockSpec((tb, 1), lambda t: (t, 0)),
    )

    out = pl.pallas_call(
        gmf_kernel,
        out_shape=jax.ShapeDtypeStruct((b_pad, 1), jnp.float32),
        grid_spec=grid_spec,
        compiler_params=pltpu.CompilerParams(
            dimension_semantics=("parallel",),           # independent tiles -> megacore OK
        ),
        cost_estimate=cost,
    )(u_g, i_g, w_row, b_smem)

    return out[:B]                                       # (B, 1)


def _reference(user_indices, item_indices, user_emb, item_emb, w, b):
    """Pure-JAX reference mirroring the PyTorch forward."""
    u = user_emb[user_indices]
    it = item_emb[item_indices]
    return jax.nn.sigmoid((u * it) @ w + b)


if __name__ == "__main__":
    # config (small, consistent with the module)
    num_users, num_items, latent_dim = 32, 48, 32
    batch = 8

    key = jax.random.PRNGKey(0)
    k1, k2, k3, k4, k5, k6 = jax.random.split(key, 6)

    # torch.nn.Embedding default init ~ N(0, 1)
    user_emb = jax.random.normal(k1, (num_users, latent_dim), jnp.float32)
    item_emb = jax.random.normal(k2, (num_items, latent_dim), jnp.float32)

    # torch.nn.Linear(latent_dim, 1) default init ~ U(-1/sqrt(D), 1/sqrt(D))
    bound = 1.0 / (latent_dim ** 0.5)
    w = jax.random.uniform(k3, (latent_dim, 1), jnp.float32, -bound, bound)
    b = jax.random.uniform(k4, (1, 1), jnp.float32, -bound, bound)

    user_indices = jax.random.randint(k5, (batch,), 0, num_users).astype(jnp.int32)
    item_indices = jax.random.randint(k6, (batch,), 0, num_items).astype(jnp.int32)

    rating = gmf_forward(user_indices, item_indices, user_emb, item_emb, w, b)
    rating = jax.block_until_ready(rating)

    ref = _reference(user_indices, item_indices, user_emb, item_emb, w, b)
    assert rating.shape == (batch, 1)
    assert jnp.allclose(rating, ref, atol=1e-5, rtol=1e-5)

    # larger batch: exercises padding with the adaptive tile size
    big_batch = 600
    k7, k8 = jax.random.split(k6)
    ui2 = jax.random.randint(k7, (big_batch,), 0, num_users).astype(jnp.int32)
    ii2 = jax.random.randint(k8, (big_batch,), 0, num_items).astype(jnp.int32)
    rating2 = jax.block_until_ready(
        gmf_forward(ui2, ii2, user_emb, item_emb, w, b)
    )
    ref2 = _reference(ui2, ii2, user_emb, item_emb, w, b)
    assert rating2.shape == (big_batch, 1)
    assert jnp.allclose(rating2, ref2, atol=1e-5, rtol=1e-5)

    # explicitly force the multi-tile (grid > 1) path with a small tile
    rating3 = jax.block_until_ready(
        gmf_forward(ui2, ii2, user_emb, item_emb, w, b, tb=128)
    )
    assert rating3.shape == (big_batch, 1)
    assert jnp.allclose(rating3, ref2, atol=1e-5, rtol=1e-5)

    print("KERNEL_OK")
</pallas_src>

<mosaic_0001>
module attributes {stable_mosaic.version = 11 : i64} {
  func.func @gmf_kernel(%arg0: i32, %arg1: memref<128x32xf32, #tpu.memory_space<vmem>>, %arg2: memref<128x32xf32, #tpu.memory_space<vmem>>, %arg3: memref<1x32xf32, #tpu.memory_space<vmem>>, %arg4: memref<1x1xf32, #tpu.memory_space<smem>>, %arg5: memref<128x1xf32, #tpu.memory_space<vmem>>) attributes {dimension_semantics = [#tpu.dimension_semantics<parallel>], iteration_bounds = array<i64: 1>, scalar_prefetch = 0 : i64, scratch_operands = 0 : i64, tpu.core_type = #tpu.core_type<tc>, window_params = [{transform_indices = @transform_0, window_bounds = array<i64: 128, 32>}, {transform_indices = @transform_1, window_bounds = array<i64: 128, 32>}, {pipeline_mode = #tpu.pipeline_mode<synchronous>, transform_indices = @transform_2, window_bounds = array<i64: 1, 32>}, {transform_indices = @transform_3, window_bounds = array<i64: 1, 1>}, {transform_indices = @transform_4, window_bounds = array<i64: 128, 1>}]} {
    %c0 = arith.constant 0 : index
    %c0_0 = arith.constant 0 : index
    %0 = vector.load %arg1[%c0, %c0_0] : memref<128x32xf32, #tpu.memory_space<vmem>>, vector<128x32xf32>
    %c0_1 = arith.constant 0 : index
    %c0_2 = arith.constant 0 : index
    %1 = vector.load %arg2[%c0_1, %c0_2] : memref<128x32xf32, #tpu.memory_space<vmem>>, vector<128x32xf32>
    %2 = arith.mulf %0, %1 : vector<128x32xf32>
    %c0_3 = arith.constant 0 : index
    %c0_4 = arith.constant 0 : index
    %3 = vector.load %arg3[%c0_3, %c0_4] : memref<1x32xf32, #tpu.memory_space<vmem>>, vector<1x32xf32>
    %4 = vector.broadcast %3 : vector<1x32xf32> to vector<128x32xf32>
    %5 = arith.mulf %2, %4 : vector<128x32xf32>
    %cst = arith.constant dense<0.000000e+00> : vector<128xf32>
    %6 = vector.multi_reduction <add>, %5, %cst [1] : vector<128x32xf32> to vector<128xf32>
    %7 = vector.shape_cast %6 : vector<128xf32> to vector<128x1xf32>
    %c0_5 = arith.constant 0 : index
    %c0_6 = arith.constant 0 : index
    %8 = memref.load %arg4[%c0_5, %c0_6] : memref<1x1xf32, #tpu.memory_space<smem>>
    %9 = vector.broadcast %8 : f32 to vector<128x1xf32>
    %10 = arith.addf %7, %9 : vector<128x1xf32>
    %11 = arith.negf %10 : vector<128x1xf32>
    %12 = math.exp %11 : vector<128x1xf32>
    %cst_7 = arith.constant 1.000000e+00 : f32
    %13 = vector.broadcast %cst_7 : f32 to vector<128x1xf32>
    %14 = arith.addf %13, %12 : vector<128x1xf32>
    %15 = arith.divf %13, %14 : vector<128x1xf32>
    %c0_8 = arith.constant 0 : index
    %c0_9 = arith.constant 0 : index
    %16 = vector.load %arg5[%c0_8, %c0_9] : memref<128x1xf32, #tpu.memory_space<vmem>>, vector<128x1xf32>
    tpu.vector_store %arg5[%c0_8, %c0_9], %15 {strides = array<i32>} : memref<128x1xf32, #tpu.memory_space<vmem>>, vector<128x1xf32>,
    return
  }
  func.func @transform_0(%arg0: i32) -> (i32, i32) {
    %c0_i32 = arith.constant 0 : i32
    %c0_i32_0 = arith.constant 0 : i32
    return %arg0, %c0_i32 : i32, i32
  }
  func.func @transform_1(%arg0: i32) -> (i32, i32) {
    %c0_i32 = arith.constant 0 : i32
    %c0_i32_0 = arith.constant 0 : i32
    return %arg0, %c0_i32 : i32, i32
  }
  func.func @transform_2(%arg0: i32) -> (i32, i32) {
    %c0_i32 = arith.constant 0 : i32
    %c0_i32_0 = arith.constant 0 : i32
    %c0_i32_1 = arith.constant 0 : i32
    return %c0_i32, %c0_i32_0 : i32, i32
  }
  func.func @transform_3(%arg0: i32) -> (i32, i32) {
    %c0_i32 = arith.constant 0 : i32
    %c0_i32_0 = arith.constant 0 : i32
    %c0_i32_1 = arith.constant 0 : i32
    return %c0_i32, %c0_i32_0 : i32, i32
  }
  func.func @transform_4(%arg0: i32) -> (i32, i32) {
    %c0_i32 = arith.constant 0 : i32
    %c0_i32_0 = arith.constant 0 : i32
    return %arg0, %c0_i32 : i32, i32
  }
}

</mosaic_0001>

<bundles_post_ra>
// kernel: tpu_custom_call.1
= control target key start
LH: loop header
LB: loop body
LE: loop exit
PB: predicated region body
PF: predicated region fallthrough
CT: control target
= control target key end

     0   :  { %vm89_vm0 = vcmask 261120   ;;  %vm252_vm1 = vcmask 7168   ;;  %s597_s0 = inlined_call_operand.vmem [shape: f32[128,32], index: 0, kind: input, shape index: {}]   ;;  %s598_s1 = inlined_call_operand.vmem [shape: f32[128,32], index: 1, kind: input, shape index: {}]   ;;  %s599_s2 = inlined_call_operand.vmem [shape: f32[1,32], index: 2, kind: input, shape index: {}]   ;;  %s600_s3 = inlined_call_operand.<no memory space> [shape: f32[1,1], index: 3, kind: input, shape index: {}]   ;;  %s601_s4 = inlined_call_operand.vmem [shape: f32[128,1], index: 4, kind: output, shape index: {}]  }
   0x1   :  { %v20_v0 = vld [vmem:[%s597_s0 + $0x10] sm:$0xff]  ;;  %v388_v2 = vld [vmem:[%s599_s2] ss:$0 sm:$0xff]  ;;  %v21_v6 = vld [vmem:[%s597_s0 + $0x18] sm:$0xff] }
   0x2   :  { %v36_v1 = vld [vmem:[%s598_s1 + $0x10] sm:$0xff]  ;;  %v18_v4 = vld [vmem:[%s597_s0] sm:$0xff]  ;;  %v37_v8 = vld [vmem:[%s598_s1 + $0x18] sm:$0xff] }
   0x3   :  { %v52_v3 = vmul.f32 %v36_v1, %v20_v0  ;;  %v34_v5 = vld [vmem:[%s598_s1] sm:$0xff]  ;;  %v19_v9 = vld [vmem:[%s597_s0 + $0x8] sm:$0xff]  ;;  %v53_v12 = vmul.f32 %v37_v8, %v21_v6  ;;  %v25_v20 = vld [vmem:[%s597_s0 + $0x38] sm:$0xff] }
   0x4   :  { %v50_v7 = vmul.f32 %v34_v5, %v18_v4  ;;  %v35_v10 = vld [vmem:[%s598_s1 + $0x8] sm:$0xff]  ;;  %v22_v16 = vld [vmem:[%s597_s0 + $0x20] sm:$0xff]  ;;  %v41_v21 = vld [vmem:[%s598_s1 + $0x38] sm:$0xff] }
   0x5   :  { %v75_v11 = vmul.f32 %v388_v2, %v52_v3  ;;  %v51_v13 = vmul.f32 %v35_v10, %v19_v9  ;;  %v23_v14 = vld [vmem:[%s597_s0 + $0x28] sm:$0xff]  ;;  %v38_v19 = vld [vmem:[%s598_s1 + $0x20] sm:$0xff]  ;;  %v76_v23 = vmul.f32 %v388_v2, %v53_v12  ;;  %v24_v26 = vld [vmem:[%s597_s0 + $0x30] sm:$0xff]  ;;  %v57_v31 = vmul.f32 %v41_v21, %v25_v20 }
   0x6   :  { %v39_v15 = vld [vmem:[%s598_s1 + $0x28] sm:$0xff]  ;;  %v73_v17 = vmul.f32 %v388_v2, %v50_v7  ;;  %v54_v25 = vmul.f32 %v38_v19, %v22_v16  ;;  %v40_v27 = vld [vmem:[%s598_s1 + $0x30] sm:$0xff]  ;;  %v26_v37 = vld [vmem:[%s597_s0 + $0x40] sm:$0xff] }
   0x7   :  { %v55_v18 = vmul.f32 %v39_v15, %v23_v14  ;;  %v96_v22 = vsel %vm89_vm0, %v75_v11, 0.0  ;;  %v74_v24 = vmul.f32 %v388_v2, %v51_v13  ;;  %v99_v29 = vsel %vm89_vm0, %v76_v23, 0.0  ;;  %v27_v35 = vld [vmem:[%s597_s0 + $0x48] sm:$0xff]  ;;  %v42_v38 = vld [vmem:[%s598_s1 + $0x40] sm:$0xff]  ;;  %v29_v45 = vld [vmem:[%s597_s0 + $0x58] sm:$0xff] }
   0x8   :  { %97 = vadd.xlane.f32.xlu1 %v96_v22  ;;  %v90_v28 = vsel %vm89_vm0, %v73_v17, 0.0  ;;  %v77_v33 = vmul.f32 %v388_v2, %v54_v25  ;;  %v56_v34 = vmul.f32 %v40_v27, %v24_v26  ;;  %v43_v36 = vld [vmem:[%s598_s1 + $0x48] sm:$0xff]  ;;  %v80_v40 = vmul.f32 %v388_v2, %v57_v31  ;;  %v45_v46 = vld [vmem:[%s598_s1 + $0x58] sm:$0xff]  ;;  %v28_v47 = vld [vmem:[%s597_s0 + $0x50] sm:$0xff] }
   0x9   :  { %91 = vadd.xlane.f32.xlu0 %v90_v28  ;;  %v78_v30 = vmul.f32 %v388_v2, %v55_v18  ;;  %v93_v32 = vsel %vm89_vm0, %v74_v24, 0.0  ;;  %v59_v41 = vmul.f32 %v43_v36, %v27_v35  ;;  %v58_v44 = vmul.f32 %v42_v38, %v26_v37  ;;  %v44_v48 = vld [vmem:[%s598_s1 + $0x50] sm:$0xff]  ;;  %v31_v55 = vld [vmem:[%s597_s0 + $0x68] sm:$0xff]  ;;  %v30_v57 = vld [vmem:[%s597_s0 + $0x60] sm:$0xff] }
   0xa   :  { %v102_v42 = vsel %vm89_vm0, %v77_v33, 0.0  ;;  %v79_v43 = vmul.f32 %v388_v2, %v56_v34  ;;  %v111_v49 = vsel %vm89_vm0, %v80_v40, 0.0  ;;  %v61_v51 = vmul.f32 %v45_v46, %v29_v45  ;;  %v47_v56 = vld [vmem:[%s598_s1 + $0x68] sm:$0xff]  ;;  %v46_v58 = vld [vmem:[%s598_s1 + $0x60] sm:$0xff]  ;;  %v33_v1 = vld [vmem:[%s597_s0 + $0x78] sm:$0xff] }
   0xb   :  { %v105_v39 = vsel %vm89_vm0, %v78_v30, 0.0  ;;  %v82_v50 = vmul.f32 %v388_v2, %v59_v41  ;;  %v81_v53 = vmul.f32 %v388_v2, %v58_v44  ;;  %v60_v54 = vmul.f32 %v44_v48, %v28_v47  ;;  %v49_v3 = vld [vmem:[%s598_s1 + $0x78] sm:$0xff]  ;;  %v32_v4 = vld [vmem:[%s597_s0 + $0x70] sm:$0xff] }
   0xc   :  { %100 = vadd.xlane.f32.xlu1 %v99_v29  ;;  %v108_v52 = vsel %vm89_vm0, %v79_v43, 0.0  ;;  %v84_v60 = vmul.f32 %v388_v2, %v61_v51  ;;  %v63_v61 = vmul.f32 %v47_v56, %v31_v55  ;;  %v62_v0 = vmul.f32 %v46_v58, %v30_v57  ;;  %v48_v5 = vld [vmem:[%s598_s1 + $0x70] sm:$0xff] }
   0xd   :  { %94 = vadd.xlane.f32.xlu0 %v93_v32  ;;  %v117_v59 = vsel %vm89_vm0, %v82_v50, 0.0  ;;  %v114_v62 = vsel %vm89_vm0, %v81_v53, 0.0  ;;  %v83_v63 = vmul.f32 %v388_v2, %v60_v54  ;;  %v65_v8 = vmul.f32 %v49_v3, %v33_v1 }
   0xe   :  { %v123_v6 = vsel %vm89_vm0, %v84_v60, 0.0  ;;  %v86_v7 = vmul.f32 %v388_v2, %v63_v61  ;;  %v85_v10 = vmul.f32 %v388_v2, %v62_v0  ;;  %v64_v11 = vmul.f32 %v48_v5, %v32_v4 }
   0xf   :  { %v120_v9 = vsel %vm89_vm0, %v83_v63, 0.0  ;;  %v88_v13 = vmul.f32 %v388_v2, %v65_v8  ;;  %v515_v18 = vstv %s600_s3 }
  0x10   :  { %106 = vadd.xlane.f32.xlu1 %v105_v39  ;;  %v129_v12 = vsel %vm89_vm0, %v86_v7, 0.0  ;;  %v126_v14 = vsel %vm89_vm0, %v85_v10, 0.0  ;;  %v87_v15 = vmul.f32 %v388_v2, %v64_v11 }
  0x11   :  { %103 = vadd.xlane.f32.xlu0 %v102_v42  ;;  %v135_v16 = vsel %vm89_vm0, %v88_v13, 0.0 }
  0x12   :  { %v132_v17 = vsel %vm89_vm0, %v87_v15, 0.0 }
  0x14   :  { %112 = vadd.xlane.f32.xlu1 %v111_v49 }
  0x15   :  { %109 = vadd.xlane.f32.xlu0 %v108_v52 }
  0x18   :  { %118 = vadd.xlane.f32.xlu1 %v117_v59 }
  0x19   :  { %115 = vadd.xlane.f32.xlu0 %v114_v62 }
  0x1c   :  { %124 = vadd.xlane.f32.xlu1 %v123_v6 }
  0x1d   :  { %121 = vadd.xlane.f32.xlu0 %v120_v9 }
  0x20   :  { %130 = vadd.xlane.f32.xlu1 %v129_v12 }
  0x21   :  { %127 = vadd.xlane.f32.xlu0 %v126_v14 }
  0x24   :  { %136 = vadd.xlane.f32.xlu1 %v135_v16 }
  0x25   :  { %133 = vadd.xlane.f32.xlu0 %v132_v17 }
  0x91   :  { %v98_v19 = vpop.xlane.xlu1 %97 }
  0x92   :  { %v142_v20 = vadd.f32 %v515_v18, %v98_v19  ;;  %v92_v21 = vpop.xlane.xlu0 %91 }
  0x93   :  { %v140_v22 = vadd.f32 %v515_v18, %v92_v21 }
  0x94   :  { %v276_v2 = vmul.f32 -1.442695, %v142_v20 }
  0x95   :  { %v274_v23 = vmul.f32 -1.442695, %v140_v22  ;;  %v101_v24 = vpop.xlane.xlu1 %100 }
  0x96   :  { %290 = vpow2.f32 %v276_v2  ;;  %v143_v25 = vadd.f32 %v515_v18, %v101_v24  ;;  %v95_v26 = vpop.xlane.xlu0 %94 }
  0x97   :  { %292 = vpow2.f32 %v274_v23  ;;  %v141_v27 = vadd.f32 %v515_v18, %v95_v26 }
  0x98   :  { %v277_v28 = vmul.f32 -1.442695, %v143_v25 }
  0x99   :  { %v275_v29 = vmul.f32 -1.442695, %v141_v27  ;;  %v107_v30 = vpop.xlane.xlu1 %106 }
  0x9a   :  { %294 = vpow2.f32 %v277_v28  ;;  %v145_v31 = vadd.f32 %v515_v18, %v107_v30  ;;  %v104_v32 = vpop.xlane.xlu0 %103 }
  0x9b   :  { %296 = vpow2.f32 %v275_v29  ;;  %v144_v33 = vadd.f32 %v515_v18, %v104_v32 }
  0x9c   :  { %v279_v34 = vmul.f32 -1.442695, %v145_v31 }
  0x9d   :  { %v278_v35 = vmul.f32 -1.442695, %v144_v33  ;;  %v113_v36 = vpop.xlane.xlu1 %112 }
  0x9e   :  { %298 = vpow2.f32 %v279_v34  ;;  %v147_v37 = vadd.f32 %v515_v18, %v113_v36  ;;  %v110_v38 = vpop.xlane.xlu0 %109 }
  0x9f   :  { %300 = vpow2.f32 %v278_v35  ;;  %v146_v39 = vadd.f32 %v515_v18, %v110_v38 }
  0xa0   :  { %v281_v40 = vmul.f32 -1.442695, %v147_v37 }
  0xa1   :  { %v280_v41 = vmul.f32 -1.442695, %v146_v39  ;;  %v119_v42 = vpop.xlane.xlu1 %118 }
  0xa2   :  { %302 = vpow2.f32 %v281_v40  ;;  %v149_v43 = vadd.f32 %v515_v18, %v119_v42  ;;  %v116_v44 = vpop.xlane.xlu0 %115 }
  0xa3   :  { %v291_v45 = vpop.eup %290  ;;  %304 = vpow2.f32 %v280_v41  ;;  %v148_v46 = vadd.f32 %v515_v18, %v116_v44 }
  0xa4   :  { %v293_v47 = vpop.eup %292  ;;  %v206_v48 = vadd.f32 1.0, %v291_v45  ;;  %v283_v49 = vmul.f32 -1.442695, %v149_v43 }
  0xa5   :  { %v204_v50 = vadd.f32 1.0, %v293_v47  ;;  %v282_v51 = vmul.f32 -1.442695, %v148_v46  ;;  %v125_v52 = vpop.xlane.xlu1 %124 }
  0xa6   :  { %306 = vrcp.f32 %v206_v48  ;;  %v151_v53 = vadd.f32 %v515_v18, %v125_v52  ;;  %v122_v54 = vpop.xlane.xlu0 %121 }
  0xa7   :  { %v295_v55 = vpop.eup %294  ;;  %308 = vrcp.f32 %v204_v50  ;;  %v150_v56 = vadd.f32 %v515_v18, %v122_v54 }
  0xa8   :  { %v297_v57 = vpop.eup %296  ;;  %v207_v58 = vadd.f32 1.0, %v295_v55  ;;  %310 = vpow2.f32 %v283_v49  ;;  %v285_v59 = vmul.f32 -1.442695, %v151_v53 }
  0xa9   :  { %v205_v60 = vadd.f32 1.0, %v297_v57  ;;  %312 = vpow2.f32 %v282_v51  ;;  %v284_v61 = vmul.f32 -1.442695, %v150_v56  ;;  %v131_v62 = vpop.xlane.xlu1 %130 }
  0xaa   :  { %314 = vrcp.f32 %v207_v58  ;;  %v153_v63 = vadd.f32 %v515_v18, %v131_v62  ;;  %v128_v0 = vpop.xlane.xlu0 %127 }
  0xab   :  { %v299_v1 = vpop.eup %298  ;;  %316 = vrcp.f32 %v205_v60  ;;  %v152_v3 = vadd.f32 %v515_v18, %v128_v0 }
  0xac   :  { %v301_v4 = vpop.eup %300  ;;  %v209_v5 = vadd.f32 1.0, %v299_v1  ;;  %318 = vpow2.f32 %v285_v59  ;;  %v287_v6 = vmul.f32 -1.442695, %v153_v63 }
  0xad   :  { %v208_v7 = vadd.f32 1.0, %v301_v4  ;;  %320 = vpow2.f32 %v284_v61  ;;  %v286_v8 = vmul.f32 -1.442695, %v152_v3  ;;  %v137_v9 = vpop.xlane.xlu1 %136 }
  0xae   :  { %322 = vrcp.f32 %v209_v5  ;;  %v155_v10 = vadd.f32 %v515_v18, %v137_v9  ;;  %v134_v11 = vpop.xlane.xlu0 %133 }
  0xaf   :  { %v303_v12 = vpop.eup %302  ;;  %324 = vrcp.f32 %v208_v7  ;;  %v154_v13 = vadd.f32 %v515_v18, %v134_v11 }
  0xb0   :  { %v305_v14 = vpop.eup %304  ;;  %v211_v15 = vadd.f32 1.0, %v303_v12  ;;  %326 = vpow2.f32 %v287_v6  ;;  %v289_v16 = vmul.f32 -1.442695, %v155_v10 }
  0xb1   :  { %v210_v17 = vadd.f32 1.0, %v305_v14  ;;  %328 = vpow2.f32 %v286_v8  ;;  %v288_v19 = vmul.f32 -1.442695, %v154_v13 }
  0xb2   :  { %330 = vrcp.f32 %v211_v15 }
  0xb3   :  { %v307_v20 = vpop.eup %306  ;;  %332 = vrcp.f32 %v210_v17 }
  0xb4   :  { %v309_v21 = vpop.eup %308  ;;  %255 = vst.msk [vmem:[%s601_s4 + $0x10] sm:$0xff] %vm252_vm1, %v307_v20  ;;  %334 = vpow2.f32 %v289_v16 }
  0xb5   :  { %v311_v22 = vpop.eup %310  ;;  %253 = vst.msk [vmem:[%s601_s4] sm:$0xff] %vm252_vm1, %v309_v21  ;;  %336 = vpow2.f32 %v288_v19 }
  0xb6   :  { %v313_v18 = vpop.eup %312  ;;  %v213_v2 = vadd.f32 1.0, %v311_v22 }
  0xb7   :  { %v315_v23 = vpop.eup %314  ;;  %v212_v24 = vadd.f32 1.0, %v313_v18 }
  0xb8   :  { %v317_v25 = vpop.eup %316  ;;  %256 = vst.msk [vmem:[%s601_s4 + $0x18] sm:$0xff] %vm252_vm1, %v315_v23  ;;  %338 = vrcp.f32 %v213_v2 }
  0xb9   :  { %v319_v26 = vpop.eup %318  ;;  %254 = vst.msk [vmem:[%s601_s4 + $0x8] sm:$0xff] %vm252_vm1, %v317_v25  ;;  %340 = vrcp.f32 %v212_v24 }
  0xba   :  { %v321_v27 = vpop.eup %320  ;;  %v215_v28 = vadd.f32 1.0, %v319_v26 }
  0xbb   :  { %v323_v29 = vpop.eup %322  ;;  %v214_v30 = vadd.f32 1.0, %v321_v27 }
  0xbc   :  { %v325_v31 = vpop.eup %324  ;;  %258 = vst.msk [vmem:[%s601_s4 + $0x28] sm:$0xff] %vm252_vm1, %v323_v29  ;;  %342 = vrcp.f32 %v215_v28 }
  0xbd   :  { %v327_v32 = vpop.eup %326  ;;  %257 = vst.msk [vmem:[%s601_s4 + $0x20] sm:$0xff] %vm252_vm1, %v325_v31  ;;  %344 = vrcp.f32 %v214_v30 }
  0xbe   :  { %v329_v33 = vpop.eup %328  ;;  %v217_v34 = vadd.f32 1.0, %v327_v32 }
  0xbf   :  { %v331_v35 = vpop.eup %330  ;;  %v216_v36 = vadd.f32 1.0, %v329_v33 }
  0xc0   :  { %v333_v37 = vpop.eup %332  ;;  %260 = vst.msk [vmem:[%s601_s4 + $0x38] sm:$0xff] %vm252_vm1, %v331_v35  ;;  %346 = vrcp.f32 %v217_v34 }
  0xc1   :  { %v335_v38 = vpop.eup %334  ;;  %259 = vst.msk [vmem:[%s601_s4 + $0x30] sm:$0xff] %vm252_vm1, %v333_v37  ;;  %348 = vrcp.f32 %v216_v36 }
  0xc2   :  { %v337_v39 = vpop.eup %336  ;;  %v219_v40 = vadd.f32 1.0, %v335_v38 }
  0xc3   :  { %v218_v41 = vadd.f32 1.0, %v337_v39 }
  0xc4   :  { %350 = vrcp.f32 %v219_v40 }
  0xc5   :  { %v339_v42 = vpop.eup %338  ;;  %352 = vrcp.f32 %v218_v41 }
  0xc6   :  { %v341_v43 = vpop.eup %340  ;;  %262 = vst.msk [vmem:[%s601_s4 + $0x48] sm:$0xff] %vm252_vm1, %v339_v42 }
  0xc7   :  { %261 = vst.msk [vmem:[%s601_s4 + $0x40] sm:$0xff] %vm252_vm1, %v341_v43 }
  0xc9   :  { %v343_v44 = vpop.eup %342 }
  0xca   :  { %v345_v45 = vpop.eup %344  ;;  %264 = vst.msk [vmem:[%s601_s4 + $0x58] sm:$0xff] %vm252_vm1, %v343_v44 }
  0xcb   :  { %263 = vst.msk [vmem:[%s601_s4 + $0x50] sm:$0xff] %vm252_vm1, %v345_v45 }
  0xcd   :  { %v347_v46 = vpop.eup %346 }
  0xce   :  { %v349_v47 = vpop.eup %348  ;;  %266 = vst.msk [vmem:[%s601_s4 + $0x68] sm:$0xff] %vm252_vm1, %v347_v46 }
  0xcf   :  { %265 = vst.msk [vmem:[%s601_s4 + $0x60] sm:$0xff] %vm252_vm1, %v349_v47 }
  0xd1   :  { %v351_v48 = vpop.eup %350 }
  0xd2   :  { %v353_v49 = vpop.eup %352  ;;  %268 = vst.msk [vmem:[%s601_s4 + $0x78] sm:$0xff] %vm252_vm1, %v351_v48 }
  0xd3   :  { %267 = vst.msk [vmem:[%s601_s4 + $0x70] sm:$0xff] %vm252_vm1, %v353_v49 }

</bundles_post_ra>
